<compile_context>
chip_gen: v5e
topology: v5e:2x2
jax: 0.10.0
libtpu: 0.0.40
codegen_flags: <defaults>
</compile_context>

<pallas_src>
import numpy as np
import jax
import jax.numpy as jnp
from jax.experimental import pallas as pl
from jax.experimental.pallas import tpu as pltpu


def _cdiv(a, b):
    return -(-a // b)


def _round_up(a, m):
    return _cdiv(a, m) * m


# ----------------------------------------------------------------------------
# Pallas kernel: out_tile = W @ X_tile   (row-mix / gather of batch rows)
# ----------------------------------------------------------------------------
def _row_mix_kernel(w_ref, x_ref, o_ref):
    # w_ref: (R, B)      -- resident across the whole F grid (index_map -> (0,0))
    # x_ref: (B, TILE_F) -- streamed (double-buffered) along the lane axis
    # o_ref: (R, TILE_F)
    o_ref[...] = jnp.dot(
        w_ref[...], x_ref[...], preferred_element_type=jnp.float32
    ).astype(o_ref.dtype)


def row_mix(w, x, *, tile_f_cap=2048, vmem_limit_bytes=32 * 1024 * 1024):
    """Compute (R, F) = (R, B) @ (B, F) on the MXU, tiled along F.

    W (tiny) stays resident in VMEM; X and the output are streamed in
    lane-dense tiles with double buffering.  The op is memory bound, so this
    puts it near the HBM roofline.
    """
    r, b = w.shape
    b2, f = x.shape
    assert b == b2, (w.shape, x.shape)

    # Lane-dense tiles: multiple of 128, capped so the double-buffered X/out
    # tiles (+ resident W) stay well under the scoped VMEM limit on every
    # generation (v7x: 64 MiB physical / 32 MiB scoped default per TC).
    f_lane = _round_up(f, 128)
    cap = tile_f_cap
    buf_budget = 8 * 1024 * 1024  # bytes for pipelined buffers
    while cap > 128 and ((r + b) * cap * 4 * 2 + r * b * 4 * 2) > buf_budget:
        cap //= 2
    num_tiles = _cdiv(f_lane, cap)
    tile_f = _round_up(_cdiv(f_lane, num_tiles), 128)
    f_pad = num_tiles * tile_f

    if f_pad != f:
        x = jnp.pad(x, ((0, 0), (0, f_pad - f)))

    out = pl.pallas_call(
        _row_mix_kernel,
        out_shape=jax.ShapeDtypeStruct((r, f_pad), x.dtype),
        grid=(num_tiles,),
        in_specs=[
            pl.BlockSpec((r, b), lambda j: (0, 0)),       # W: same block every step
            pl.BlockSpec((b, tile_f), lambda j: (0, j)),  # X: streamed along F
        ],
        out_specs=pl.BlockSpec((r, tile_f), lambda j: (0, j)),
        compiler_params=pltpu.CompilerParams(
            dimension_semantics=("parallel",),            # shard F across TCs (v7x)
            vmem_limit_bytes=vmem_limit_bytes,
        ),
        cost_estimate=pl.CostEstimate(
            flops=2 * r * b * f_pad,
            transcendentals=0,
            bytes_accessed=(r * b + b * f_pad + r * f_pad) * 4,
        ),
    )(w, x)
    return out[:, :f] if f_pad != f else out


# ----------------------------------------------------------------------------
# Host-side (glue) sampler logic: mirrors MIntOODSampler.forward control flow.
# ----------------------------------------------------------------------------
class Args:
    ood_label_id = -1
    multiple_ood = 1.0
    binary_multiple_ood = 1.0
    alpha = 1.0
    select_number_min = 2
    select_number_max = 3
    ablation_type = "full"  # not 'sampler_beta' -> Dirichlet branch


class MIntOODSamplerPallas:
    def __init__(self, args, seed=0):
        self.args = args
        self.ood_label_id = args.ood_label_id
        self._rng = np.random.default_rng(seed)

    def _build_mix_matrices(self, batch, label_ids_np, ext_mask_lengths, num_ood):
        """Rejection-sample candidate sets / Dirichlet weights (host side).

        Vectorized: proposals are drawn in batched chunks, invalid (single
        distinct label) rows are rejected, and W/G are filled with NumPy
        scatter ops instead of per-element Python writes.

        Returns:
          W: (num_ood, batch) float32 mixing weights (rows sum to 1)
          G: (num_ood, batch) float32 one-hot gather matrix (min-length idx)
          select_elems: bookkeeping list like the reference
        """
        # TODO(synk): the data-dependent rejection-sampling loop (np.random
        # candidate selection) has no Pallas equivalent; it stays on host.
        rng = self._rng
        a = self.args
        W = np.zeros((num_ood, batch), dtype=np.float32)
        G = np.zeros((num_ood, batch), dtype=np.float32)
        select_elems = []
        n = 0
        while n < num_ood:
            if a.select_number_min == a.select_number_max:
                k = a.select_number_min
            else:
                k = int(rng.integers(a.select_number_min, a.select_number_max + 1))
            if batch < k:
                continue
            chunk = max(num_ood - n, 1) * 2
            # Per-row random permutation -> k distinct candidate indices each.
            perm = np.argsort(rng.random((chunk, batch)), axis=1)[:, :k]
            labs = label_ids_np[perm]
            valid = (labs != labs[:, :1]).any(axis=1)  # >= 2 distinct labels
            perm = perm[valid]
            if perm.shape[0] == 0:
                continue
            take = min(perm.shape[0], num_ood - n)
            perm = perm[:take]
            s = rng.dirichlet(alpha=[a.alpha] * k, size=take).astype(np.float32)
            rows = np.arange(n, n + take)
            np.add.at(W, (rows[:, None], perm), s)
            lens = np.asarray(ext_mask_lengths)[perm]            # (take, k)
            min_idx = perm[np.arange(take), np.argmin(lens, axis=1)]
            G[rows, min_idx] = 1.0
            for r in range(take):
                select_elems.append([perm[r].tolist(), s[r].tolist()])
            n += take
        return W, G, select_elems

    def forward(
        self,
        ind_text_feats,           # (B, T_txt, H_txt) float32
        ind_video_data,           # (B, T_vid, H_vid) float32
        ind_audio_data,           # (B, T_aud, H_aud) float32
        ind_label_ids,            # (B,) int32
        extended_attention_mask,  # (B, 1, 1, T_txt) float32
        attention_mask,           # (B, T_txt) float32
        device=None,
        binary=False,
        ood_elems=None,
    ):
        B = ind_text_feats.shape[0]
        if binary:
            num_ood = int(B * self.args.binary_multiple_ood)
        else:
            num_ood = int(B * self.args.multiple_ood)
        R = B + num_ood

        text_seq, text_h = ind_text_feats.shape[1], ind_text_feats.shape[2]
        vid_seq, vid_h = ind_video_data.shape[1], ind_video_data.shape[2]
        aud_seq, aud_h = ind_audio_data.shape[1], ind_audio_data.shape[2]

        # ---- host-side candidate selection (mask lengths, label ids) -------
        label_ids_np = np.asarray(ind_label_ids)
        ext_mask_np = np.asarray(extended_attention_mask)
        ext_mask_lengths = ext_mask_np.reshape(B, -1).sum(axis=1)
        W_np, G_np, select_elems = self._build_mix_matrices(
            B, label_ids_np, ext_mask_lengths, num_ood
        )

        # Fold the ind/ood concatenation into the matmul:
        #   W' = [I_B; W]  -> mix_feat  = W' @ flatten(ind_feat)
        #   G' = [I_B; G]  -> mix_masks = G' @ flatten(masks)
        # Stacked into one array so there is a single H2D transfer.
        WG_np = np.zeros((2, R, B), dtype=np.float32)
        WG_np[0, :B, :B] = np.eye(B, dtype=np.float32)
        WG_np[0, B:, :] = W_np
        WG_np[1, :B, :B] = np.eye(B, dtype=np.float32)
        WG_np[1, B:, :] = G_np
        WG = jnp.asarray(WG_np)
        Wp, Gp = WG[0], WG[1]

        # ---- device-side mixing via Pallas ----------------------------------
        text_flat = ind_text_feats.reshape(B, -1)
        vid_flat = ind_video_data.reshape(B, -1)
        aud_flat = ind_audio_data.reshape(B, -1)

        mix_text = row_mix(Wp, text_flat).reshape(R, text_seq, text_h)
        mix_video = row_mix(Wp, vid_flat).reshape(R, vid_seq, vid_h)
        mix_audio = row_mix(Wp, aud_flat).reshape(R, aud_seq, aud_h)

        # Pack both masks side-by-side along the lane axis -> one G launch.
        ext_mask_flat = extended_attention_mask.reshape(B, -1)   # (B, M1)
        attn_mask_flat = attention_mask.reshape(B, -1)           # (B, M2)
        m1 = ext_mask_flat.shape[1]
        m2 = attn_mask_flat.shape[1]
        packed_masks = jnp.concatenate([ext_mask_flat, attn_mask_flat], axis=1)
        mixed_masks = row_mix(Gp, packed_masks)                  # (R, M1+M2)
        mix_mask = mixed_masks[:, :m1].reshape(
            R,
            extended_attention_mask.shape[1],
            extended_attention_mask.shape[2],
            extended_attention_mask.shape[3],
        )
        mix_attention_mask = mixed_masks[:, m1 : m1 + m2].reshape(R, -1)

        # ---- labels (glue) ---------------------------------------------------
        semi_label_ids = jnp.concatenate(
            (
                ind_label_ids,
                jnp.full((num_ood,), self.ood_label_id, dtype=ind_label_ids.dtype),
            ),
            axis=0,
        )
        binary_label_ids = jnp.concatenate(
            (jnp.ones((B,), dtype=jnp.int32), jnp.zeros((num_ood,), dtype=jnp.int32)),
            axis=0,
        )

        mix_data = {
            "text": mix_text,
            "video": mix_video,
            "audio": mix_audio,
            "mask": mix_mask,
            "attention_mask": mix_attention_mask,
        }
        mix_labels = {
            "ind": ind_label_ids,
            "semi": semi_label_ids,
            "binary": binary_label_ids,
            "select_elems": select_elems,
        }
        return mix_data, mix_labels


# ----------------------------------------------------------------------------
# Demo / smoke test
# ----------------------------------------------------------------------------
if __name__ == "__main__":
    key = jax.random.PRNGKey(0)
    k_txt, k_vid, k_aud = jax.random.split(key, 3)

    B = 8
    T_txt, H_txt = 8, 32
    T_vid, H_vid = 8, 32
    T_aud, H_aud = 8, 32

    ind_text_feats = jax.random.normal(k_txt, (B, T_txt, H_txt), dtype=jnp.float32)
    ind_video_data = jax.random.normal(k_vid, (B, T_vid, H_vid), dtype=jnp.float32)
    ind_audio_data = jax.random.normal(k_aud, (B, T_aud, H_aud), dtype=jnp.float32)
    ind_label_ids = jnp.array([0, 1, 2, 3, 0, 1, 2, 3], dtype=jnp.int32)

    # Variable-length 0/1 masks (deterministic lengths).
    lengths = np.array([8, 6, 7, 5, 8, 4, 6, 7])
    attn_np = np.zeros((B, T_txt), dtype=np.float32)
    for i, L in enumerate(lengths):
        attn_np[i, :L] = 1.0
    attention_mask = jnp.asarray(attn_np)
    extended_attention_mask = attention_mask.reshape(B, 1, 1, T_txt)

    sampler = MIntOODSamplerPallas(Args(), seed=0)
    mix_data, mix_labels = sampler.forward(
        ind_text_feats,
        ind_video_data,
        ind_audio_data,
        ind_label_ids,
        extended_attention_mask,
        attention_mask,
        binary=False,
    )

    jax.block_until_ready(mix_data["text"])
    jax.block_until_ready(mix_data["video"])
    jax.block_until_ready(mix_data["audio"])
    jax.block_until_ready(mix_data["mask"])
    jax.block_until_ready(mix_data["attention_mask"])
    jax.block_until_ready(mix_labels["semi"])

    num_ood = int(B * Args.multiple_ood)
    R = B + num_ood

    # Shape checks mirroring the reference semantics.
    assert mix_data["text"].shape == (R, T_txt, H_txt)
    assert mix_data["video"].shape == (R, T_vid, H_vid)
    assert mix_data["audio"].shape == (R, T_aud, H_aud)
    assert mix_data["mask"].shape == (R, 1, 1, T_txt)
    assert mix_data["attention_mask"].shape == (R, T_txt)
    assert mix_labels["semi"].shape == (R,)
    assert mix_labels["binary"].shape == (R,)

    # The first B rows come from the identity block of W'/G' -> must match the
    # in-distribution inputs; the OOD mask rows must be exact gathers of
    # existing mask rows (one-hot matmul).
    assert np.allclose(np.asarray(mix_data["text"][:B]), np.asarray(ind_text_feats),
                       rtol=1e-6, atol=1e-6)
    assert np.allclose(np.asarray(mix_data["attention_mask"][:B]), attn_np,
                       rtol=0, atol=0)
    ood_attn = np.asarray(mix_data["attention_mask"][B:])
    assert all(any(np.array_equal(row, attn_np[i]) for i in range(B)) for row in ood_attn)

    print("KERNEL_OK")
</pallas_src>

<mosaic_0001>
module attributes {stable_mosaic.version = 11 : i64} {
  func.func @_row_mix_kernel(%arg0: i32, %arg1: memref<16x8xf32, #tpu.memory_space<vmem>>, %arg2: memref<8x256xf32, #tpu.memory_space<vmem>>, %arg3: memref<16x256xf32, #tpu.memory_space<vmem>>) attributes {dimension_semantics = [#tpu.dimension_semantics<parallel>], iteration_bounds = array<i64: 1>, scalar_prefetch = 0 : i64, scratch_operands = 0 : i64, tpu.core_type = #tpu.core_type<tc>, window_params = [{pipeline_mode = #tpu.pipeline_mode<synchronous>, transform_indices = @transform_0, window_bounds = array<i64: 16, 8>}, {transform_indices = @transform_1, window_bounds = array<i64: 8, 256>}, {transform_indices = @transform_2, window_bounds = array<i64: 16, 256>}]} {
    %c0 = arith.constant 0 : index
    %c0_0 = arith.constant 0 : index
    %0 = vector.load %arg1[%c0, %c0_0] : memref<16x8xf32, #tpu.memory_space<vmem>>, vector<16x8xf32>
    %c0_1 = arith.constant 0 : index
    %c0_2 = arith.constant 0 : index
    %1 = vector.load %arg2[%c0_1, %c0_2] : memref<8x256xf32, #tpu.memory_space<vmem>>, vector<8x256xf32>
    %cst = arith.constant dense<0.000000e+00> : vector<16x256xf32>
    %2 = tpu.matmul %0, %1, %cst {dimension_numbers = #tpu.dot_dimension_numbers<[1], [0], [0], [1], [0, 0, 1, 1], [], []>} : vector<16x8xf32>, vector<8x256xf32>, vector<16x256xf32> -> vector<16x256xf32>
    %c0_3 = arith.constant 0 : index
    %c0_4 = arith.constant 0 : index
    %3 = vector.load %arg3[%c0_3, %c0_4] : memref<16x256xf32, #tpu.memory_space<vmem>>, vector<16x256xf32>
    tpu.vector_store %arg3[%c0_3, %c0_4], %2 {strides = array<i32>} : memref<16x256xf32, #tpu.memory_space<vmem>>, vector<16x256xf32>,
    return
  }
  func.func @transform_0(%arg0: i32) -> (i32, i32) {
    %c0_i32 = arith.constant 0 : i32
    %c0_i32_0 = arith.constant 0 : i32
    %c0_i32_1 = arith.constant 0 : i32
    return %c0_i32, %c0_i32_0 : i32, i32
  }
  func.func @transform_1(%arg0: i32) -> (i32, i32) {
    %c0_i32 = arith.constant 0 : i32
    %c0_i32_0 = arith.constant 0 : i32
    return %c0_i32, %arg0 : i32, i32
  }
  func.func @transform_2(%arg0: i32) -> (i32, i32) {
    %c0_i32 = arith.constant 0 : i32
    %c0_i32_0 = arith.constant 0 : i32
    return %c0_i32, %arg0 : i32, i32
  }
}

</mosaic_0001>

<bundles_post_ra>
// kernel: tpu_custom_call.1
= control target key start
LH: loop header
LB: loop body
LE: loop exit
PB: predicated region body
PF: predicated region fallthrough
CT: control target
= control target key end

     0   :  { %vm16_vm0 = vcmask 64512   ;;  %s159_s0 = inlined_call_operand.vmem [shape: f32[16,8], index: 0, kind: input, shape index: {}]   ;;  %s160_s1 = inlined_call_operand.vmem [shape: f32[8,256], index: 1, kind: input, shape index: {}]   ;;  %s161_s2 = inlined_call_operand.hbm [shape: f32[16,256], index: 2, kind: output, shape index: {}]  }
   0x1   :  { %v14_v0 = vld [vmem:[%s160_s1] sm:$0xff]  ;;  %v15_v1 = vld [vmem:[%s160_s1 + $0x8] sm:$0xff] }
   0x2   :  { %v13_v2 = vld [vmem:[%s159_s0 + $0x8] sm:$0xff]  ;;  %95 = vmatpush.msra.mxu2 %v14_v0  ;;  %96 = vmatpush.msra.mxu3 %v15_v1  ;;  %v12_v3 = vld [vmem:[%s159_s0] sm:$0xff] }
   0x3   :  { %7 = vsyncpa [#allocation3], 0  ;;  %92 = vmatmul.msk.f32.vlgmr.msra.gmra.mxu2 %vm16_vm0, %v13_v2  ;;  %94 = vmatmul.msk.f32.vlgmr.msra.gmra.mxu3 %vm16_vm0, %v13_v2  ;;  %s126_s1 = smov [#allocation2]   ;;  %s79_s20 = sshll.u32 %s161_s2, 4  ;;  %s80_s20 = int_to_ptr.hbm [resolvable:$true] %s79_s20 }
   0x4   :  { %38 = vmatpush.msra.mxu0 %v14_v0  ;;  %61 = vmatpush.msra.mxu1 %v15_v1  ;;  %s77_s17 = sshll.u32 %s126_s1, 4  ;;  %s127_s0 = smov 256   ;;  %s78_s17 = int_to_ptr.vmem [resolvable:$true] %s77_s17 }
   0x5   :  { %91 = vmatmul.msk.f32.vlgmr.msra.gmra.mxu0 %vm16_vm0, %v12_v3  ;;  %93 = vmatmul.msk.f32.vlgmr.msra.gmra.mxu1 %vm16_vm0, %v12_v3  ;;  %s128_s21 = smov 16  }
  0x82   :  { %v40_v4 = vpop.f32.mrf.mxu0  ;;  %v63_v5 = vpop.f32.mrf.mxu1 }
  0x83   :  { %69 = vst [vmem:[#allocation2] sm:$0xff] %v40_v4 }
  0x84   :  { %70 = vst [vmem:[#allocation2 + $0x8] sm:$0xff] %v63_v5 }
  0x86   :  { %v43_v6 = vpop.f32.mrf.mxu2  ;;  %v66_v7 = vpop.f32.mrf.mxu3 }
  0x87   :  { %71 = vst [vmem:[#allocation2 + $0x10] sm:$0xff] %v43_v6 }
  0x88   :  { %72 = vst [vmem:[#allocation2 + $0x18] sm:$0xff] %v66_v7 }
  0x89   :  { %85 = dma.vmem_to_hbm [thread:$0]  %s78_s17, 512, %s80_s20, [#allocation3], %s127_s0, %s127_s0, %s128_s21  }
  0x8a   :  { %124 = dma.done.wait [#allocation3], 512  }
  0x8b   :  { %125 = vsyncadd [#allocation3], 4294966784 }
  0x8c   :  { %90 = vsyncpa [#allocation3], 1 }

</bundles_post_ra>
